<compile_context>
chip_gen: v7x
topology: tpu7x:2x2x1
jax: 0.10.0
libtpu: 0.0.40
codegen_flags: <defaults>
</compile_context>

<pallas_src>
import functools

import jax
import jax.numpy as jnp
from jax.experimental import pallas as pl
from jax.experimental.pallas import tpu as pltpu


def _round_up(n, m):
    return ((n + m - 1) // m) * m


def mlp_kernel(x_ref, w1_ref, b1_ref, w2_ref, b2_ref, o_ref):
    # fc1: (TB, D) bf16 @ (D, H) bf16 -> f32 accumulate on the MXU.
    h = jnp.dot(x_ref[...], w1_ref[...], preferred_element_type=jnp.float32)
    h = jnp.maximum(h + b1_ref[...], 0.0)                 # bias + ReLU in f32
    # fc2: (TB, H) bf16 @ (H, C) bf16 -> f32 accumulate.
    logits = jnp.dot(h.astype(jnp.bfloat16), w2_ref[...],
                     preferred_element_type=jnp.float32)
    logits = logits + b2_ref[...]
    o_ref[...] = jax.nn.sigmoid(logits).astype(o_ref.dtype)   # EUP transcendental


@functools.partial(jax.jit, static_argnames=("tb",))
def neural_net_forward(x, w1, b1, w2, b2, *, tb=128):
    """x: (B, D_in) f32; w1: (D_in, H); b1: (1, H); w2: (H, C); b2: (1, C)."""
    B, d_in = x.shape
    h_dim = w1.shape[1]
    c = w2.shape[1]

    # Lane-dense padding: feature dims -> multiple of 128, batch -> multiple of TB.
    d_pad = _round_up(d_in, 128)
    h_pad = _round_up(h_dim, 128)
    c_pad = _round_up(c, 128)
    b_pad = _round_up(B, tb)

    xp = jnp.pad(x, ((0, b_pad - B), (0, d_pad - d_in))).astype(jnp.bfloat16)
    w1p = jnp.pad(w1, ((0, d_pad - d_in), (0, h_pad - h_dim))).astype(jnp.bfloat16)
    b1p = jnp.pad(b1, ((0, 0), (0, h_pad - h_dim))).astype(jnp.float32)
    w2p = jnp.pad(w2, ((0, h_pad - h_dim), (0, c_pad - c))).astype(jnp.bfloat16)
    b2p = jnp.pad(b2, ((0, 0), (0, c_pad - c))).astype(jnp.float32)

    grid = (b_pad // tb,)

    out = pl.pallas_call(
        mlp_kernel,
        out_shape=jax.ShapeDtypeStruct((b_pad, c_pad), jnp.float32),
        grid_spec=pl.GridSpec(
            grid=grid,
            in_specs=[
                # x streams in batch tiles (double-buffered HBM->VMEM).
                pl.BlockSpec((tb, d_pad), lambda i: (i, 0)),
                # Weights / biases: constant block index -> fetched once,
                # VMEM-resident across all grid steps.
                pl.BlockSpec((d_pad, h_pad), lambda i: (0, 0)),
                pl.BlockSpec((1, h_pad), lambda i: (0, 0)),
                pl.BlockSpec((h_pad, c_pad), lambda i: (0, 0)),
                pl.BlockSpec((1, c_pad), lambda i: (0, 0)),
            ],
            out_specs=pl.BlockSpec((tb, c_pad), lambda i: (i, 0)),
        ),
        compiler_params=pltpu.CompilerParams(
            dimension_semantics=("parallel",),      # megacore sharding on v7x
            vmem_limit_bytes=32 * 1024 * 1024,
        ),
    )(xp, w1p, b1p, w2p, b2p)

    # Strip batch / class padding.
    return out[:B, :c]


if __name__ == "__main__":
    # Small shapes consistent with NeuralNet(input_size, hidden_size, num_classes).
    batch = 200          # deliberately not a multiple of TB to exercise padding
    input_size = 32
    hidden_size = 64
    num_classes = 16

    key = jax.random.PRNGKey(0)
    kx, k1, kb1, k2, kb2 = jax.random.split(key, 5)

    x = jax.random.normal(kx, (batch, input_size), dtype=jnp.float32)

    # Deterministic param init (uniform, like nn.Linear's default range).
    lim1 = 1.0 / (input_size ** 0.5)
    w1 = jax.random.uniform(k1, (input_size, hidden_size), jnp.float32,
                            minval=-lim1, maxval=lim1)
    b1 = jax.random.uniform(kb1, (1, hidden_size), jnp.float32,
                            minval=-lim1, maxval=lim1)

    lim2 = 1.0 / (hidden_size ** 0.5)
    w2 = jax.random.uniform(k2, (hidden_size, num_classes), jnp.float32,
                            minval=-lim2, maxval=lim2)
    b2 = jax.random.uniform(kb2, (1, num_classes), jnp.float32,
                            minval=-lim2, maxval=lim2)

    out = neural_net_forward(x, w1, b1, w2, b2)
    jax.block_until_ready(out)

    # Sanity check against pure-JAX f32 reference (bf16 operands -> looser tol).
    ref = jax.nn.sigmoid(jnp.maximum(x @ w1 + b1, 0.0) @ w2 + b2)
    assert out.shape == (batch, num_classes)
    assert jnp.allclose(out, ref, atol=1e-2, rtol=1e-2), \
        float(jnp.max(jnp.abs(out - ref)))

    print("KERNEL_OK")
</pallas_src>

<mosaic_0001>
module attributes {stable_mosaic.version = 11 : i64} {
  func.func @mlp_kernel(%arg0: i32, %arg1: memref<128x128xbf16, #tpu.memory_space<vmem>>, %arg2: memref<128x128xbf16, #tpu.memory_space<vmem>>, %arg3: memref<1x128xf32, #tpu.memory_space<vmem>>, %arg4: memref<128x128xbf16, #tpu.memory_space<vmem>>, %arg5: memref<1x128xf32, #tpu.memory_space<vmem>>, %arg6: memref<128x128xf32, #tpu.memory_space<vmem>>) attributes {dimension_semantics = [#tpu.dimension_semantics<parallel>], iteration_bounds = array<i64: 2>, scalar_prefetch = 0 : i64, scratch_operands = 0 : i64, tpu.core_type = #tpu.core_type<tc>, window_params = [{transform_indices = @transform_0, window_bounds = array<i64: 128, 128>}, {pipeline_mode = #tpu.pipeline_mode<synchronous>, transform_indices = @transform_1, window_bounds = array<i64: 128, 128>}, {pipeline_mode = #tpu.pipeline_mode<synchronous>, transform_indices = @transform_2, window_bounds = array<i64: 1, 128>}, {pipeline_mode = #tpu.pipeline_mode<synchronous>, transform_indices = @transform_3, window_bounds = array<i64: 128, 128>}, {pipeline_mode = #tpu.pipeline_mode<synchronous>, transform_indices = @transform_4, window_bounds = array<i64: 1, 128>}, {transform_indices = @transform_5, window_bounds = array<i64: 128, 128>}]} {
    %c0 = arith.constant 0 : index
    %c0_0 = arith.constant 0 : index
    %0 = vector.load %arg1[%c0, %c0_0] : memref<128x128xbf16, #tpu.memory_space<vmem>>, vector<128x128xbf16>
    %c0_1 = arith.constant 0 : index
    %c0_2 = arith.constant 0 : index
    %1 = vector.load %arg2[%c0_1, %c0_2] : memref<128x128xbf16, #tpu.memory_space<vmem>>, vector<128x128xbf16>
    %cst = arith.constant dense<0.000000e+00> : vector<128x128xf32>
    %2 = tpu.matmul %0, %1, %cst {dimension_numbers = #tpu.dot_dimension_numbers<[1], [0], [0], [1], [0, 0, 1, 1], [], []>} : vector<128x128xbf16>, vector<128x128xbf16>, vector<128x128xf32> -> vector<128x128xf32>
    %c0_3 = arith.constant 0 : index
    %c0_4 = arith.constant 0 : index
    %3 = vector.load %arg3[%c0_3, %c0_4] : memref<1x128xf32, #tpu.memory_space<vmem>>, vector<1x128xf32>
    %4 = vector.broadcast %3 : vector<1x128xf32> to vector<128x128xf32>
    %5 = arith.addf %2, %4 : vector<128x128xf32>
    %cst_5 = arith.constant 0.000000e+00 : f32
    %6 = vector.broadcast %cst_5 : f32 to vector<128x128xf32>
    %7 = arith.maximumf %5, %6 : vector<128x128xf32>
    %8 = arith.truncf %7 : vector<128x128xf32> to vector<128x128xbf16>
    %c0_6 = arith.constant 0 : index
    %c0_7 = arith.constant 0 : index
    %9 = vector.load %arg4[%c0_6, %c0_7] : memref<128x128xbf16, #tpu.memory_space<vmem>>, vector<128x128xbf16>
    %cst_8 = arith.constant dense<0.000000e+00> : vector<128x128xf32>
    %10 = tpu.matmul %8, %9, %cst_8 {dimension_numbers = #tpu.dot_dimension_numbers<[1], [0], [0], [1], [0, 0, 1, 1], [], []>} : vector<128x128xbf16>, vector<128x128xbf16>, vector<128x128xf32> -> vector<128x128xf32>
    %c0_9 = arith.constant 0 : index
    %c0_10 = arith.constant 0 : index
    %11 = vector.load %arg5[%c0_9, %c0_10] : memref<1x128xf32, #tpu.memory_space<vmem>>, vector<1x128xf32>
    %12 = vector.broadcast %11 : vector<1x128xf32> to vector<128x128xf32>
    %13 = arith.addf %10, %12 : vector<128x128xf32>
    %14 = arith.negf %13 : vector<128x128xf32>
    %15 = math.exp %14 : vector<128x128xf32>
    %cst_11 = arith.constant 1.000000e+00 : f32
    %16 = vector.broadcast %cst_11 : f32 to vector<128x128xf32>
    %17 = arith.addf %16, %15 : vector<128x128xf32>
    %18 = arith.divf %16, %17 : vector<128x128xf32>
    %c0_12 = arith.constant 0 : index
    %c0_13 = arith.constant 0 : index
    %19 = vector.load %arg6[%c0_12, %c0_13] : memref<128x128xf32, #tpu.memory_space<vmem>>, vector<128x128xf32>
    tpu.vector_store %arg6[%c0_12, %c0_13], %18 {strides = array<i32>} : memref<128x128xf32, #tpu.memory_space<vmem>>, vector<128x128xf32>,
    return
  }
  func.func @transform_0(%arg0: i32) -> (i32, i32) {
    %c0_i32 = arith.constant 0 : i32
    %c0_i32_0 = arith.constant 0 : i32
    return %arg0, %c0_i32 : i32, i32
  }
  func.func @transform_1(%arg0: i32) -> (i32, i32) {
    %c0_i32 = arith.constant 0 : i32
    %c0_i32_0 = arith.constant 0 : i32
    %c0_i32_1 = arith.constant 0 : i32
    return %c0_i32, %c0_i32_0 : i32, i32
  }
  func.func @transform_2(%arg0: i32) -> (i32, i32) {
    %c0_i32 = arith.constant 0 : i32
    %c0_i32_0 = arith.constant 0 : i32
    %c0_i32_1 = arith.constant 0 : i32
    return %c0_i32, %c0_i32_0 : i32, i32
  }
  func.func @transform_3(%arg0: i32) -> (i32, i32) {
    %c0_i32 = arith.constant 0 : i32
    %c0_i32_0 = arith.constant 0 : i32
    %c0_i32_1 = arith.constant 0 : i32
    return %c0_i32, %c0_i32_0 : i32, i32
  }
  func.func @transform_4(%arg0: i32) -> (i32, i32) {
    %c0_i32 = arith.constant 0 : i32
    %c0_i32_0 = arith.constant 0 : i32
    %c0_i32_1 = arith.constant 0 : i32
    return %c0_i32, %c0_i32_0 : i32, i32
  }
  func.func @transform_5(%arg0: i32) -> (i32, i32) {
    %c0_i32 = arith.constant 0 : i32
    %c0_i32_0 = arith.constant 0 : i32
    return %arg0, %c0_i32 : i32, i32
  }
}

</mosaic_0001>

<bundles_post_ra>
// kernel: neural_net_forward.1
= control target key start
LH: loop header
LB: loop body
LE: loop exit
PB: predicated region body
PF: predicated region fallthrough
CT: control target
= control target key end

     0   :  { %s1104_s18 = smov 0   ;;  %s1225_s0 = inlined_call_operand.vmem [shape: bf16[256,128], index: 0, kind: input, shape index: {}]   ;;  %s1226_s1 = inlined_call_operand.vmem [shape: bf16[128,128], index: 1, kind: input, shape index: {}]   ;;  %s1227_s2 = inlined_call_operand.vmem [shape: f32[1,128], index: 2, kind: input, shape index: {}]   ;;  %s1228_s3 = inlined_call_operand.vmem [shape: bf16[128,128], index: 3, kind: input, shape index: {}]   ;;  %s1229_s4 = inlined_call_operand.vmem [shape: f32[1,128], index: 4, kind: input, shape index: {}]   ;;  %s1230_s5 = inlined_call_operand.vmem [shape: f32[256,128], index: 5, kind: output, shape index: {}]  }
   0x1 LB: > { %s821_s19 = sadd.s32 4294967295, %s1072_s18   ;;  %p825_p0 = scmp.ge.s32.totalorder %s1072_s18, 1  ;;  %s1072_s18 = sphi %s1104_s18, %s15_s18  }
   0x2   : > { %p188_p1 = scmp.lt.s32.totalorder %s1072_s18, 3 }
   0x4   : > { %p189_p2 = pnand %p825_p0, %p188_p1 }
   0x5   : > { %v978_v0 = vld [vmem:[%s1226_s1] sm:$0xff] (!%p189_p2)   ;;  %s826_s22 = sshll.u32 (!%p189_p2), %s821_s19, 4  ;;  %v979_v1 = vld [vmem:[%s1226_s1 + $0x8] sm:$0xff] (!%p189_p2)   ;;  %v980_v2 = vld [vmem:[%s1226_s1 + $0x10] sm:$0xff] (!%p189_p2)  }
   0x6   : > { %192 = sbr.rel (%p189_p2) target bundleno = 529 (0x211), region = 40  ;;  %p217_p3 = scmp.lt.s32.totalorder (!%p189_p2), %s826_s22, 31  ;;  %906 = vmatprep.subr.bf16.mxu0 (!%p189_p2), %v978_v0  ;;  %v981_v3 = vld [vmem:[%s1226_s1 + $0x18] sm:$0xff] (!%p189_p2)   ;;  %v982_v5 = vld [vmem:[%s1226_s1 + $0x20] sm:$0xff] (!%p189_p2)   ;;  %v983_v6 = vld [vmem:[%s1226_s1 + $0x28] sm:$0xff] (!%p189_p2)  }
   0x7   : > { %907 = vmatpush3.bf16.msra.mxu0 (!%p189_p2), %v978_v0  ;;  %v994_v7 = vld [vmem:[%s1228_s3] sm:$0xff] (!%p189_p2)   ;;  %v995_v8 = vld [vmem:[%s1228_s3 + $0x8] sm:$0xff] (!%p189_p2)   ;;  %v984_v9 = vld [vmem:[%s1226_s1 + $0x30] sm:$0xff] (!%p189_p2)  }
   0x8   : > { %908 = vmatprep.subr.bf16.mxu0 (!%p189_p2), %v979_v1  ;;  %938 = vmatprep.subr.bf16.mxu1 (!%p189_p2), %v994_v7  ;;  %v996_v10 = vld [vmem:[%s1228_s3 + $0x10] sm:$0xff] (!%p189_p2)   ;;  %v985_v11 = vld [vmem:[%s1226_s1 + $0x38] sm:$0xff] (!%p189_p2)   ;;  %v998_v13 = vld [vmem:[%s1228_s3 + $0x20] sm:$0xff] (!%p189_p2)  }
   0x9   : > { %939 = vmatpush3.bf16.msra.mxu1 (!%p189_p2), %v994_v7  ;;  %v997_v12 = vld [vmem:[%s1228_s3 + $0x18] sm:$0xff] (!%p189_p2)   ;;  %v999_v16 = vld [vmem:[%s1228_s3 + $0x28] sm:$0xff] (!%p189_p2)   ;;  %v1000_v22 = vld [vmem:[%s1228_s3 + $0x30] sm:$0xff] (!%p189_p2)  }
   0xa   : > { %940 = vmatprep.subr.bf16.mxu1 (!%p189_p2), %v995_v8  ;;  %v1001_v23 = vld [vmem:[%s1228_s3 + $0x38] sm:$0xff] (!%p189_p2)   ;;  %v830_v24 = vld [vmem:[%s1227_s2] ss:$0 sm:$0xff] (!%p189_p2) }
   0xb   : > { %909 = vmatpush3.bf16.msra.mxu0 (!%p189_p2), %v979_v1 }
   0xc   : > { %910 = vmatprep.subr.bf16.mxu0 (!%p189_p2), %v980_v2 }
   0xd   : > { %s1232_s22 = smov (!%p217_p3, %s826_s22), 31  ;;  %941 = vmatpush3.bf16.msra.mxu1 %v995_v8 }
   0xe   : > { %s827_s27 = sshll.u32 %s1232_s22, 2  ;;  %942 = vmatprep.subr.bf16.mxu1 %v996_v10  ;;  %s829_s13 = sshll.u32 %s1232_s22, 3 }
   0xf   : > { %s1127_s30 = scalar_lea.vmem %s1225_s0, %s827_s27  ;;  %911 = vmatpush3.bf16.msra.mxu0 %v980_v2  ;;  %s1201_s16 = scalar_lea.vmem %s1230_s5, %s829_s13 }
  0x10   : > { %v986_v4 = vld [vmem:[%s1127_s30] sm:$0xff]   ;;  %912 = vmatprep.subr.bf16.mxu0 %v981_v3  ;;  %v987_v14 = vld [vmem:[%s1127_s30 + $0x8] sm:$0xff]   ;;  %v988_v15 = vld [vmem:[%s1127_s30 + $0x10] sm:$0xff]  }
  0x11   : > { %922 = vmatprep.mubr.bf16.mxu0 %v986_v4  ;;  %943 = vmatpush3.bf16.msra.mxu1 %v996_v10  ;;  %v989_v17 = vld [vmem:[%s1127_s30 + $0x18] sm:$0xff]   ;;  %v990_v18 = vld [vmem:[%s1127_s30 + $0x20] sm:$0xff]   ;;  %v991_v19 = vld [vmem:[%s1127_s30 + $0x28] sm:$0xff]  }
  0x12   : > { %944 = vmatprep.subr.bf16.mxu1 %v997_v12  ;;  %v992_v20 = vld [vmem:[%s1127_s30 + $0x30] sm:$0xff]   ;;  %v993_v21 = vld [vmem:[%s1127_s30 + $0x38] sm:$0xff]  }
  0x13   : > { %913 = vmatpush3.bf16.msra.mxu0 %v981_v3 }
  0x14   : > { %914 = vmatprep.subr.bf16.mxu0 %v982_v5 }
  0x15   : > { %945 = vmatpush3.bf16.msra.mxu1 %v997_v12 }
  0x16   : > { %946 = vmatprep.subr.bf16.mxu1 %v998_v13 }
  0x17   : > { %915 = vmatpush3.bf16.msra.mxu0 %v982_v5 }
  0x18   : > { %916 = vmatprep.subr.bf16.mxu0 %v983_v6 }
  0x19   : > { %947 = vmatpush3.bf16.msra.mxu1 %v998_v13 }
  0x1a   : > { %948 = vmatprep.subr.bf16.mxu1 %v999_v16 }
  0x1b   : > { %917 = vmatpush3.bf16.msra.mxu0 %v983_v6 }
  0x1c   : > { %918 = vmatprep.subr.bf16.mxu0 %v984_v9 }
  0x1d   : > { %949 = vmatpush3.bf16.msra.mxu1 %v999_v16 }
  0x1e   : > { %950 = vmatprep.subr.bf16.mxu1 %v1000_v22 }
  0x1f   : > { %919 = vmatpush3.bf16.msra.mxu0 %v984_v9 }
  0x20   : > { %920 = vmatprep.subr.bf16.mxu0 %v985_v11 }
  0x21   : > { %951 = vmatpush3.bf16.msra.mxu1 %v1000_v22 }
  0x22   : > { %952 = vmatprep.subr.bf16.mxu1 %v1001_v23 }
  0x23   : > { %921 = vmatpush3.bf16.msra.mxu0 %v985_v11 }
  0x25   : > { %953 = vmatpush3.bf16.msra.mxu1 %v1001_v23 }
  0x26   : > { %923 = vmatmul.mubr.bf16.vlgmr.msra.gmra.mrb[0].mxu0 %v987_v14 }
  0x27   : > { %926 = vmatprep.mubr.bf16.mxu0 %v988_v15 }
  0x2e   : > { %927 = vmatmul.mubr.bf16.gmra.mrb[4].mxu0 %v989_v17  ;;  %v1182_v17 = vld [vmem:[%s1229_s4] ss:$0 sm:$0xff] }
  0x2f   : > { %930 = vmatprep.mubr.bf16.mxu0 %v990_v18 }
  0x36   : > { %931 = vmatmul.mubr.bf16.gmra.mrb[8].mxu0 %v991_v19 }
  0x37   : > { %934 = vmatprep.mubr.bf16.mxu0 %v992_v20 }
  0x3e   : > { %935 = vmatmul.mubr.bf16.gmra.mrb[12].mxu0 %v993_v21 }
  0xf9   : > { %v924_v25 = vpop.f32.mrb[0].mxu0 }
  0xfa   : > { %v407_v26 = vadd.f32 %v924_v25, %v830_v24  ;;  %v398_v27 = vpop.f32.mrb[1].mxu0 }
  0xfb   : > { %v399_v28 = vadd.f32 %v830_v24, %v398_v27  ;;  %v925_v29 = vpop.f32.mrb[2].mxu0 }
  0xfc   : > { %v410_v30 = vadd.f32 %v925_v29, %v830_v24  ;;  %v401_v31 = vpop.f32.mrb[3].mxu0  ;;  %v463_v33 = vmax.f32 %v407_v26, 0.0 }
  0xfd   : > { %v402_v32 = vadd.f32 %v830_v24, %v401_v31  ;;  %v461_v35 = vmax.f32 %v399_v28, 0.0 }
  0xfe   : > { %v464_v34 = vmax.f32 %v410_v30, 0.0 }
  0xff   : > { %v462_v36 = vmax.f32 %v402_v32, 0.0 }
 0x100   : > { %v478_v37 = vpack.c.bf16 %v464_v34, %v463_v33 }
 0x101   : > { %v928_v38 = vpop.f32.mrb[4].mxu0  ;;  %v477_v39 = vpack.c.bf16 %v462_v36, %v461_v35 }
 0x102   : > { %v423_v40 = vadd.f32 %v928_v38, %v830_v24  ;;  %v414_v41 = vpop.f32.mrb[5].mxu0 }
 0x103   : > { %v415_v42 = vadd.f32 %v830_v24, %v414_v41  ;;  %v929_v43 = vpop.f32.mrb[6].mxu0  ;;  %954 = vmatprep.mubr.bf16.mxu1 %v477_v39 }
 0x104   : > { %v426_v44 = vadd.f32 %v929_v43, %v830_v24  ;;  %v417_v45 = vpop.f32.mrb[7].mxu0  ;;  %955 = vmatmul.mubr.bf16.vlgmr.msra.gmra.mrb[0].mxu1 %v478_v37  ;;  %v467_v47 = vmax.f32 %v423_v40, 0.0 }
 0x105   : > { %v418_v46 = vadd.f32 %v830_v24, %v417_v45  ;;  %v465_v49 = vmax.f32 %v415_v42, 0.0 }
 0x106   : > { %v468_v48 = vmax.f32 %v426_v44, 0.0 }
 0x107   : > { %v466_v50 = vmax.f32 %v418_v46, 0.0 }
 0x108   : > { %v480_v51 = vpack.c.bf16 %v468_v48, %v467_v47 }
 0x109   : > { %v479_v52 = vpack.c.bf16 %v466_v50, %v465_v49  ;;  %v932_v53 = vpop.f32.mrb[8].mxu0 }
 0x10a   : > { %v439_v54 = vadd.f32 %v932_v53, %v830_v24  ;;  %v430_v55 = vpop.f32.mrb[9].mxu0 }
 0x10b   : > { %v431_v56 = vadd.f32 %v830_v24, %v430_v55  ;;  %v933_v57 = vpop.f32.mrb[10].mxu0  ;;  %958 = vmatprep.mubr.bf16.mxu1 %v479_v52 }
 0x10c   : > { %v442_v58 = vadd.f32 %v933_v57, %v830_v24  ;;  %v433_v59 = vpop.f32.mrb[11].mxu0  ;;  %959 = vmatmul.mubr.bf16.gmra.mrb[4].mxu1 %v480_v51  ;;  %v471_v61 = vmax.f32 %v439_v54, 0.0 }
 0x10d   : > { %v434_v60 = vadd.f32 %v830_v24, %v433_v59  ;;  %v469_v63 = vmax.f32 %v431_v56, 0.0 }
 0x10e   : > { %v472_v62 = vmax.f32 %v442_v58, 0.0 }
 0x10f   : > { %v470_v0 = vmax.f32 %v434_v60, 0.0 }
 0x110   : > { %v482_v1 = vpack.c.bf16 %v472_v62, %v471_v61 }
 0x111   : > { %v481_v2 = vpack.c.bf16 %v470_v0, %v469_v63  ;;  %v936_v3 = vpop.f32.mrb[12].mxu0 }
 0x112   : > { %v455_v4 = vadd.f32 %v936_v3, %v830_v24  ;;  %v446_v5 = vpop.f32.mrb[13].mxu0 }
 0x113   : > { %v447_v6 = vadd.f32 %v830_v24, %v446_v5  ;;  %v937_v7 = vpop.f32.mrb[14].mxu0  ;;  %962 = vmatprep.mubr.bf16.mxu1 %v481_v2 }
 0x114   : > { %v458_v8 = vadd.f32 %v937_v7, %v830_v24  ;;  %v449_v9 = vpop.f32.mrb[15].mxu0  ;;  %963 = vmatmul.mubr.bf16.gmra.mrb[8].mxu1 %v482_v1  ;;  %v475_v11 = vmax.f32 %v455_v4, 0.0 }
 0x115   : > { %v450_v10 = vadd.f32 %v830_v24, %v449_v9  ;;  %v473_v13 = vmax.f32 %v447_v6, 0.0 }
 0x116   : > { %v476_v12 = vmax.f32 %v458_v8, 0.0 }
 0x117   : > { %v474_v14 = vmax.f32 %v450_v10, 0.0 }
 0x118   : > { %v484_v15 = vpack.c.bf16 %v476_v12, %v475_v11 }
 0x119   : > { %v483_v16 = vpack.c.bf16 %v474_v14, %v473_v13 }
 0x11b   : > { %966 = vmatprep.mubr.bf16.mxu1 %v483_v16 }
 0x11c   : > { %967 = vmatmul.mubr.bf16.gmra.mrb[12].mxu1 %v484_v15 }
 0x1d7   : > { %v956_v18 = vpop.f32.mrb[0].mxu1 }
 0x1d8   : > { %v599_v19 = vadd.f32 %v956_v18, %v1182_v17  ;;  %v590_v20 = vpop.f32.mrb[1].mxu1 }
 0x1d9   : > { %v591_v21 = vadd.f32 %v1182_v17, %v590_v20  ;;  %v957_v22 = vpop.f32.mrb[2].mxu1 }
 0x1da   : > { %v858_v23 = vmul.f32 -1.442695, %v599_v19  ;;  %v602_v24 = vadd.f32 %v957_v22, %v1182_v17  ;;  %v593_v25 = vpop.f32.mrb[3].mxu1 }
 0x1db   : > { %v856_v26 = vmul.f32 -1.442695, %v591_v21  ;;  %v594_v27 = vadd.f32 %v1182_v17, %v593_v25 }
 0x1dc   : > { %1002 = vpow2.f32 %v858_v23  ;;  %v859_v28 = vmul.f32 -1.442695, %v602_v24 }
 0x1dd   : > { %1004 = vpow2.f32 %v856_v26  ;;  %v857_v29 = vmul.f32 -1.442695, %v594_v27 }
 0x1de   : > { %1006 = vpow2.f32 %v859_v28 }
 0x1df   : > { %1008 = vpow2.f32 %v857_v29  ;;  %v960_v30 = vpop.f32.mrb[4].mxu1 }
 0x1e0   : > { %v615_v31 = vadd.f32 %v960_v30, %v1182_v17  ;;  %v606_v32 = vpop.f32.mrb[5].mxu1 }
 0x1e1   : > { %v607_v33 = vadd.f32 %v1182_v17, %v606_v32  ;;  %v961_v34 = vpop.f32.mrb[6].mxu1 }
 0x1e2   : > { %v862_v35 = vmul.f32 -1.442695, %v615_v31  ;;  %v618_v36 = vadd.f32 %v961_v34, %v1182_v17  ;;  %v609_v37 = vpop.f32.mrb[7].mxu1 }
 0x1e3   : > { %v860_v38 = vmul.f32 -1.442695, %v607_v33  ;;  %v610_v39 = vadd.f32 %v1182_v17, %v609_v37 }
 0x1e4   : > { %1010 = vpow2.f32 %v862_v35  ;;  %v863_v40 = vmul.f32 -1.442695, %v618_v36 }
 0x1e5   : > { %1012 = vpow2.f32 %v860_v38  ;;  %v861_v41 = vmul.f32 -1.442695, %v610_v39 }
 0x1e6   : > { %v1003_v42 = vpop.eup %1002  ;;  %1014 = vpow2.f32 %v863_v40 }
 0x1e7   : > { %v1005_v43 = vpop.eup %1004  ;;  %v703_v44 = vadd.f32 1.0, %v1003_v42  ;;  %1016 = vpow2.f32 %v861_v41  ;;  %v964_v45 = vpop.f32.mrb[8].mxu1 }
 0x1e8   : > { %v1007_v46 = vpop.eup %1006  ;;  %v701_v47 = vadd.f32 1.0, %v1005_v43  ;;  %v631_v48 = vadd.f32 %v964_v45, %v1182_v17  ;;  %v622_v49 = vpop.f32.mrb[9].mxu1 }
 0x1e9   : > { %v1009_v50 = vpop.eup %1008  ;;  %1018 = vrcp.f32 %v703_v44  ;;  %v704_v51 = vadd.f32 1.0, %v1007_v46  ;;  %v623_v52 = vadd.f32 %v1182_v17, %v622_v49  ;;  %v965_v53 = vpop.f32.mrb[10].mxu1 }
 0x1ea   : > { %1020 = vrcp.f32 %v701_v47  ;;  %v702_v54 = vadd.f32 1.0, %v1009_v50  ;;  %v866_v55 = vmul.f32 -1.442695, %v631_v48  ;;  %v634_v56 = vadd.f32 %v965_v53, %v1182_v17  ;;  %v625_v57 = vpop.f32.mrb[11].mxu1 }
 0x1eb   : > { %1022 = vrcp.f32 %v704_v51  ;;  %v864_v58 = vmul.f32 -1.442695, %v623_v52  ;;  %v626_v59 = vadd.f32 %v1182_v17, %v625_v57 }
 0x1ec   : > { %1024 = vrcp.f32 %v702_v54  ;;  %v867_v60 = vmul.f32 -1.442695, %v634_v56 }
 0x1ed   : > { %1026 = vpow2.f32 %v866_v55  ;;  %v865_v61 = vmul.f32 -1.442695, %v626_v59 }
 0x1ee   : > { %v1011_v62 = vpop.eup %1010  ;;  %1028 = vpow2.f32 %v864_v58 }
 0x1ef   : > { %v1013_v63 = vpop.eup %1012  ;;  %v707_v0 = vadd.f32 1.0, %v1011_v62  ;;  %1030 = vpow2.f32 %v867_v60  ;;  %v968_v1 = vpop.f32.mrb[12].mxu1 }
 0x1f0   : > { %v1015_v2 = vpop.eup %1014  ;;  %v705_v3 = vadd.f32 1.0, %v1013_v63  ;;  %1032 = vpow2.f32 %v865_v61  ;;  %v647_v4 = vadd.f32 %v968_v1, %v1182_v17  ;;  %v638_v5 = vpop.f32.mrb[13].mxu1 }
 0x1f1   : > { %v1017_v6 = vpop.eup %1016  ;;  %1034 = vrcp.f32 %v707_v0  ;;  %v708_v7 = vadd.f32 1.0, %v1015_v2  ;;  %v639_v8 = vadd.f32 %v1182_v17, %v638_v5  ;;  %v969_v9 = vpop.f32.mrb[14].mxu1 }
 0x1f2   : > { %1036 = vrcp.f32 %v705_v3  ;;  %v706_v10 = vadd.f32 1.0, %v1017_v6  ;;  %v870_v11 = vmul.f32 -1.442695, %v647_v4  ;;  %v650_v12 = vadd.f32 %v969_v9, %v1182_v17  ;;  %v641_v13 = vpop.f32.mrb[15].mxu1 }
 0x1f3   : > { %v1019_v14 = vpop.eup %1018  ;;  %1038 = vrcp.f32 %v708_v7  ;;  %v868_v15 = vmul.f32 -1.442695, %v639_v8  ;;  %v642_v16 = vadd.f32 %v1182_v17, %v641_v13 }
 0x1f4   : > { %v1021_v18 = vpop.eup %1020  ;;  %751 = vst [vmem:[%s1201_s16 + $0x10] sm:$0xff] %v1019_v14  ;;  %1040 = vrcp.f32 %v706_v10  ;;  %v871_v19 = vmul.f32 -1.442695, %v650_v12 }
 0x1f5   : > { %v1023_v20 = vpop.eup %1022  ;;  %749 = vst [vmem:[%s1201_s16] sm:$0xff] %v1021_v18  ;;  %1042 = vpow2.f32 %v870_v11  ;;  %v869_v21 = vmul.f32 -1.442695, %v642_v16 }
 0x1f6   : > { %v1025_v22 = vpop.eup %1024  ;;  %752 = vst [vmem:[%s1201_s16 + $0x18] sm:$0xff] %v1023_v20  ;;  %1044 = vpow2.f32 %v868_v15 }
 0x1f7   : > { %v1027_v23 = vpop.eup %1026  ;;  %750 = vst [vmem:[%s1201_s16 + $0x8] sm:$0xff] %v1025_v22  ;;  %1046 = vpow2.f32 %v871_v19 }
 0x1f8   : > { %v1029_v24 = vpop.eup %1028  ;;  %v711_v25 = vadd.f32 1.0, %v1027_v23  ;;  %1048 = vpow2.f32 %v869_v21 }
 0x1f9   : > { %v1031_v17 = vpop.eup %1030  ;;  %v709_v26 = vadd.f32 1.0, %v1029_v24 }
 0x1fa   : > { %v1033_v27 = vpop.eup %1032  ;;  %1050 = vrcp.f32 %v711_v25  ;;  %v712_v28 = vadd.f32 1.0, %v1031_v17 }
 0x1fb   : > { %v1035_v29 = vpop.eup %1034  ;;  %1052 = vrcp.f32 %v709_v26  ;;  %v710_v30 = vadd.f32 1.0, %v1033_v27 }
 0x1fc   : > { %v1037_v31 = vpop.eup %1036  ;;  %755 = vst [vmem:[%s1201_s16 + $0x30] sm:$0xff] %v1035_v29  ;;  %1054 = vrcp.f32 %v712_v28 }
 0x1fd   : > { %v1039_v32 = vpop.eup %1038  ;;  %753 = vst [vmem:[%s1201_s16 + $0x20] sm:$0xff] %v1037_v31  ;;  %1056 = vrcp.f32 %v710_v30 }
 0x1fe   : > { %v1041_v33 = vpop.eup %1040  ;;  %756 = vst [vmem:[%s1201_s16 + $0x38] sm:$0xff] %v1039_v32 }
 0x1ff   : > { %v1043_v34 = vpop.eup %1042  ;;  %754 = vst [vmem:[%s1201_s16 + $0x28] sm:$0xff] %v1041_v33 }
 0x200   : > { %v1045_v35 = vpop.eup %1044  ;;  %v715_v36 = vadd.f32 1.0, %v1043_v34 }
 0x201   : > { %v1047_v37 = vpop.eup %1046  ;;  %v713_v38 = vadd.f32 1.0, %v1045_v35 }
 0x202   : > { %v1049_v39 = vpop.eup %1048  ;;  %1058 = vrcp.f32 %v715_v36  ;;  %v716_v40 = vadd.f32 1.0, %v1047_v37 }
 0x203   : > { %1060 = vrcp.f32 %v713_v38  ;;  %v714_v41 = vadd.f32 1.0, %v1049_v39 }
 0x204   : > { %v1051_v42 = vpop.eup %1050  ;;  %1062 = vrcp.f32 %v716_v40 }
 0x205   : > { %v1053_v43 = vpop.eup %1052  ;;  %759 = vst [vmem:[%s1201_s16 + $0x50] sm:$0xff] %v1051_v42  ;;  %1064 = vrcp.f32 %v714_v41 }
 0x206   : > { %v1055_v44 = vpop.eup %1054  ;;  %757 = vst [vmem:[%s1201_s16 + $0x40] sm:$0xff] %v1053_v43 }
 0x207   : > { %v1057_v45 = vpop.eup %1056  ;;  %760 = vst [vmem:[%s1201_s16 + $0x58] sm:$0xff] %v1055_v44 }
 0x208   : > { %758 = vst [vmem:[%s1201_s16 + $0x48] sm:$0xff] %v1057_v45 }
 0x20c   : > { %v1059_v46 = vpop.eup %1058 }
 0x20d   : > { %v1061_v47 = vpop.eup %1060  ;;  %763 = vst [vmem:[%s1201_s16 + $0x70] sm:$0xff] %v1059_v46 }
 0x20e   : > { %v1063_v48 = vpop.eup %1062  ;;  %761 = vst [vmem:[%s1201_s16 + $0x60] sm:$0xff] %v1061_v47 }
 0x20f   : > { %v1065_v49 = vpop.eup %1064  ;;  %764 = vst [vmem:[%s1201_s16 + $0x78] sm:$0xff] %v1063_v48 }
 0x210   : > { %762 = vst [vmem:[%s1201_s16 + $0x68] sm:$0xff] %v1065_v49 }
 0x211 PF: > { %s15_s18 = sadd.s32 1, %s1072_s18  }
 0x212   : > { %p12_p4 = scmp.ge.s32.totalorder %s15_s18, 4  }
 0x214   :  { %14 = sbr.rel (!%p12_p4) target bundleno = 1 (0x1), region = 70 }

</bundles_post_ra>
